<compile_context>
chip_gen: v7x
topology: tpu7x:2x2x1
jax: 0.10.0
libtpu: 0.0.40
codegen_flags: <defaults>
</compile_context>

<pallas_src>
import functools

import jax
import jax.numpy as jnp
from jax import lax
from jax.experimental import pallas as pl
from jax.experimental.pallas import tpu as pltpu


def _policy_kernel(xT_ref, w1_ref, w2_ref, wh_ref, b_ref, out_ref,
                   *, h1, h2, act, mxu_dtype):
    """Fused forward pass, transposed layout: features on sublanes, batch on lanes."""
    xT = xT_ref[...]                                   # [obs, TILE_B], f32

    # Packed biases (column vectors broadcast along the lane/batch axis).
    b1 = b_ref[0:h1, :]                                # [h1, 1]
    b2 = b_ref[h1:h1 + h2, :]                          # [h2, 1]
    bh = b_ref[h1 + h2:h1 + h2 + 2 * act, :]           # [2*act, 1]

    # shared_net: Linear -> Tanh -> Linear -> Tanh  (weights in PyTorch [out, in])
    a1 = jnp.tanh(
        jnp.dot(w1_ref[...].astype(mxu_dtype), xT.astype(mxu_dtype),
                preferred_element_type=jnp.float32) + b1)          # [h1, TILE_B]
    a2 = jnp.tanh(
        jnp.dot(w2_ref[...].astype(mxu_dtype), a1.astype(mxu_dtype),
                preferred_element_type=jnp.float32) + b2)          # [h2, TILE_B]

    # Fused heads: rows [0:act] = mean, rows [act:2*act] = stddev pre-activation.
    z = jnp.dot(wh_ref[...].astype(mxu_dtype), a2.astype(mxu_dtype),
                preferred_element_type=jnp.float32) + bh           # [2*act, TILE_B]

    # Numerically stable softplus: max(z, 0) + log1p(exp(-|z|))  (== log(1+exp(z)))
    sp = jnp.maximum(z, 0.0) + jnp.log1p(jnp.exp(-jnp.abs(z)))
    row = lax.broadcasted_iota(jnp.int32, z.shape, 0)
    out_ref[...] = jnp.where(row < act, z, sp)


def prepare_params(params):
    """One-time (hoisted) repack of PyTorch-layout params into kernel layout."""
    h1, obs = params["w1"].shape
    h2 = params["w2"].shape[0]
    act = params["wm"].shape[0]
    wh = jnp.concatenate([params["wm"], params["ws"]], axis=0)      # [2*act, h2]
    b_packed = jnp.concatenate(
        [params["b1"], params["b2"], params["bm"], params["bs"]]
    ).astype(jnp.float32).reshape(-1, 1)                            # [h1+h2+2*act, 1]
    return {
        "w1": params["w1"].astype(jnp.float32),                     # [h1, obs]
        "w2": params["w2"].astype(jnp.float32),                     # [h2, h1]
        "wh": wh.astype(jnp.float32),                               # [2*act, h2]
        "b": b_packed,
        "dims": (obs, h1, h2, act),
    }


def policy_network_forward(x, prep, *, tile_b=512, mxu_dtype=jnp.float32):
    """x: [B, obs] (batch major, like nn.Linear). Returns (means, stddevs): [B, act]."""
    obs, h1, h2, act = prep["dims"]
    B = x.shape[0]

    # Lane-dense layout plumbing: put batch on the lane axis.
    xT = x.astype(jnp.float32).T                                    # [obs, B]

    # Batch tile: full B when small, otherwise a 128-multiple tile (default 512).
    tb = B if B <= tile_b else tile_b
    grid = (pl.cdiv(B, tb),)

    kernel = functools.partial(_policy_kernel, h1=h1, h2=h2, act=act,
                               mxu_dtype=mxu_dtype)

    out = pl.pallas_call(
        kernel,
        out_shape=jax.ShapeDtypeStruct((2 * act, B), jnp.float32),
        grid=grid,
        in_specs=[
            pl.BlockSpec((obs, tb), lambda i: (0, i)),              # x^T: tiled over batch
            pl.BlockSpec((h1, obs), lambda i: (0, 0)),              # resident weights
            pl.BlockSpec((h2, h1), lambda i: (0, 0)),
            pl.BlockSpec((2 * act, h2), lambda i: (0, 0)),
            pl.BlockSpec((h1 + h2 + 2 * act, 1), lambda i: (0, 0)),  # packed biases
        ],
        out_specs=pl.BlockSpec((2 * act, tb), lambda i: (0, i)),    # lane-dense output slab
        compiler_params=pltpu.CompilerParams(
            dimension_semantics=("parallel",)),                      # v7x: shard over 2 TCs
    )(xT, prep["w1"], prep["w2"], prep["wh"], prep["b"])

    outT = out.T                                                    # [B, 2*act]
    return outT[:, :act], outT[:, act:]


def init_params(key, obs_space_dims, action_space_dims,
                hidden_space1=16, hidden_space2=32):
    """Deterministic synthetic init matching the PyTorch module's shapes
    (weight: [out, in], bias: [out])."""
    ks = jax.random.split(key, 8)

    def linear_init(kw, kb, fan_in, fan_out):
        bound = 1.0 / jnp.sqrt(fan_in)
        w = jax.random.uniform(kw, (fan_out, fan_in), jnp.float32, -bound, bound)
        b = jax.random.uniform(kb, (fan_out,), jnp.float32, -bound, bound)
        return w, b

    w1, b1 = linear_init(ks[0], ks[1], obs_space_dims, hidden_space1)
    w2, b2 = linear_init(ks[2], ks[3], hidden_space1, hidden_space2)
    wm, bm = linear_init(ks[4], ks[5], hidden_space2, action_space_dims)
    ws, bs = linear_init(ks[6], ks[7], hidden_space2, action_space_dims)
    return {"w1": w1, "b1": b1, "w2": w2, "b2": b2,
            "wm": wm, "bm": bm, "ws": ws, "bs": bs}


def reference_forward(x, params):
    """Pure-JAX reference of the PyTorch forward (softplus in stable form)."""
    h1 = jnp.tanh(x @ params["w1"].T + params["b1"])
    h2 = jnp.tanh(h1 @ params["w2"].T + params["b2"])
    means = h2 @ params["wm"].T + params["bm"]
    stddevs = jax.nn.softplus(h2 @ params["ws"].T + params["bs"])
    return means, stddevs


if __name__ == "__main__":
    key = jax.random.PRNGKey(0)
    k_x, k_p = jax.random.split(key)

    B = 8                  # batch of observations
    obs_space_dims = 8     # small obs dim
    action_space_dims = 4  # small action dim

    x = jax.random.normal(k_x, (B, obs_space_dims), dtype=jnp.float32)
    params = init_params(k_p, obs_space_dims, action_space_dims)
    prep = prepare_params(params)   # hoisted: computed once, reused every call

    means, stddevs = policy_network_forward(x, prep)
    jax.block_until_ready((means, stddevs))

    ref_means, ref_stddevs = reference_forward(x, params)
    assert means.shape == (B, action_space_dims)
    assert stddevs.shape == (B, action_space_dims)
    assert jnp.allclose(means, ref_means, atol=1e-5, rtol=1e-5)
    assert jnp.allclose(stddevs, ref_stddevs, atol=1e-5, rtol=1e-5)
    assert bool(jnp.all(stddevs > 0.0))

    print("KERNEL_OK")
</pallas_src>

<mosaic_0001>
module attributes {stable_mosaic.version = 11 : i64} {
  func.func @_policy_kernel(%arg0: i32, %arg1: memref<8x8xf32, #tpu.memory_space<vmem>>, %arg2: memref<16x8xf32, #tpu.memory_space<vmem>>, %arg3: memref<32x16xf32, #tpu.memory_space<vmem>>, %arg4: memref<8x32xf32, #tpu.memory_space<vmem>>, %arg5: memref<56x1xf32, #tpu.memory_space<vmem>>, %arg6: memref<8x8xf32, #tpu.memory_space<vmem>>) attributes {dimension_semantics = [#tpu.dimension_semantics<parallel>], iteration_bounds = array<i64: 1>, scalar_prefetch = 0 : i64, scratch_operands = 0 : i64, tpu.core_type = #tpu.core_type<tc>, window_params = [{transform_indices = @transform_0, window_bounds = array<i64: 8, 8>}, {pipeline_mode = #tpu.pipeline_mode<synchronous>, transform_indices = @transform_1, window_bounds = array<i64: 16, 8>}, {pipeline_mode = #tpu.pipeline_mode<synchronous>, transform_indices = @transform_2, window_bounds = array<i64: 32, 16>}, {pipeline_mode = #tpu.pipeline_mode<synchronous>, transform_indices = @transform_3, window_bounds = array<i64: 8, 32>}, {pipeline_mode = #tpu.pipeline_mode<synchronous>, transform_indices = @transform_4, window_bounds = array<i64: 56, 1>}, {transform_indices = @transform_5, window_bounds = array<i64: 8, 8>}]} {
    %c0 = arith.constant 0 : index
    %c0_0 = arith.constant 0 : index
    %0 = vector.load %arg1[%c0, %c0_0] : memref<8x8xf32, #tpu.memory_space<vmem>>, vector<8x8xf32>
    %c0_1 = arith.constant 0 : index
    %c0_2 = arith.constant 0 : index
    %1 = vector.load %arg5[%c0_1, %c0_2] : memref<56x1xf32, #tpu.memory_space<vmem>>, vector<16x1xf32>
    %c16 = arith.constant 16 : index
    %c0_3 = arith.constant 0 : index
    %2 = vector.load %arg5[%c16, %c0_3] : memref<56x1xf32, #tpu.memory_space<vmem>>, vector<32x1xf32>
    %c48 = arith.constant 48 : index
    %c0_4 = arith.constant 0 : index
    %3 = vector.load %arg5[%c48, %c0_4] : memref<56x1xf32, #tpu.memory_space<vmem>>, vector<8x1xf32>
    %c0_5 = arith.constant 0 : index
    %c0_6 = arith.constant 0 : index
    %4 = vector.load %arg2[%c0_5, %c0_6] : memref<16x8xf32, #tpu.memory_space<vmem>>, vector<16x8xf32>
    %cst = arith.constant dense<0.000000e+00> : vector<16x8xf32>
    %5 = tpu.matmul %4, %0, %cst {dimension_numbers = #tpu.dot_dimension_numbers<[1], [0], [0], [1], [0, 0, 1, 1], [], []>} : vector<16x8xf32>, vector<8x8xf32>, vector<16x8xf32> -> vector<16x8xf32>
    %6 = vector.broadcast %1 : vector<16x1xf32> to vector<16x8xf32>
    %7 = arith.addf %5, %6 : vector<16x8xf32>
    %8 = math.tanh %7 : vector<16x8xf32>
    %c0_7 = arith.constant 0 : index
    %c0_8 = arith.constant 0 : index
    %9 = vector.load %arg3[%c0_7, %c0_8] : memref<32x16xf32, #tpu.memory_space<vmem>>, vector<32x16xf32>
    %cst_9 = arith.constant dense<0.000000e+00> : vector<32x8xf32>
    %10 = tpu.matmul %9, %8, %cst_9 {dimension_numbers = #tpu.dot_dimension_numbers<[1], [0], [0], [1], [0, 0, 1, 1], [], []>} : vector<32x16xf32>, vector<16x8xf32>, vector<32x8xf32> -> vector<32x8xf32>
    %11 = vector.broadcast %2 : vector<32x1xf32> to vector<32x8xf32>
    %12 = arith.addf %10, %11 : vector<32x8xf32>
    %13 = math.tanh %12 : vector<32x8xf32>
    %c0_10 = arith.constant 0 : index
    %c0_11 = arith.constant 0 : index
    %14 = vector.load %arg4[%c0_10, %c0_11] : memref<8x32xf32, #tpu.memory_space<vmem>>, vector<8x32xf32>
    %cst_12 = arith.constant dense<0.000000e+00> : vector<8x8xf32>
    %15 = tpu.matmul %14, %13, %cst_12 {dimension_numbers = #tpu.dot_dimension_numbers<[1], [0], [0], [1], [0, 0, 1, 1], [], []>} : vector<8x32xf32>, vector<32x8xf32>, vector<8x8xf32> -> vector<8x8xf32>
    %16 = vector.broadcast %3 : vector<8x1xf32> to vector<8x8xf32>
    %17 = arith.addf %15, %16 : vector<8x8xf32>
    %cst_13 = arith.constant 0.000000e+00 : f32
    %18 = vector.broadcast %cst_13 : f32 to vector<8x8xf32>
    %19 = arith.maximumf %17, %18 : vector<8x8xf32>
    %20 = math.absf %17 : vector<8x8xf32>
    %cst_14 = arith.constant 0.000000e+00 : f32
    %21 = vector.broadcast %cst_14 : f32 to vector<8x8xf32>
    %22 = arith.subf %21, %20 : vector<8x8xf32>
    %23 = math.exp %22 : vector<8x8xf32>
    %24 = math.log1p %23 : vector<8x8xf32>
    %25 = arith.addf %19, %24 : vector<8x8xf32>
    %26 = tpu.iota {dimensions = array<i32: 0>} : vector<8x8xi32>
    %c4_i32 = arith.constant 4 : i32
    %27 = vector.broadcast %c4_i32 : i32 to vector<8x8xi32>
    %28 = arith.cmpi slt, %26, %27 : vector<8x8xi32>
    %29 = arith.select %28, %17, %25 : vector<8x8xi1>, vector<8x8xf32>
    %c0_15 = arith.constant 0 : index
    %c0_16 = arith.constant 0 : index
    %30 = vector.load %arg6[%c0_15, %c0_16] : memref<8x8xf32, #tpu.memory_space<vmem>>, vector<8x8xf32>
    tpu.vector_store %arg6[%c0_15, %c0_16], %29 {strides = array<i32>} : memref<8x8xf32, #tpu.memory_space<vmem>>, vector<8x8xf32>,
    return
  }
  func.func @transform_0(%arg0: i32) -> (i32, i32) {
    %c0_i32 = arith.constant 0 : i32
    %c0_i32_0 = arith.constant 0 : i32
    return %c0_i32, %arg0 : i32, i32
  }
  func.func @transform_1(%arg0: i32) -> (i32, i32) {
    %c0_i32 = arith.constant 0 : i32
    %c0_i32_0 = arith.constant 0 : i32
    %c0_i32_1 = arith.constant 0 : i32
    return %c0_i32, %c0_i32_0 : i32, i32
  }
  func.func @transform_2(%arg0: i32) -> (i32, i32) {
    %c0_i32 = arith.constant 0 : i32
    %c0_i32_0 = arith.constant 0 : i32
    %c0_i32_1 = arith.constant 0 : i32
    return %c0_i32, %c0_i32_0 : i32, i32
  }
  func.func @transform_3(%arg0: i32) -> (i32, i32) {
    %c0_i32 = arith.constant 0 : i32
    %c0_i32_0 = arith.constant 0 : i32
    %c0_i32_1 = arith.constant 0 : i32
    return %c0_i32, %c0_i32_0 : i32, i32
  }
  func.func @transform_4(%arg0: i32) -> (i32, i32) {
    %c0_i32 = arith.constant 0 : i32
    %c0_i32_0 = arith.constant 0 : i32
    %c0_i32_1 = arith.constant 0 : i32
    return %c0_i32, %c0_i32_0 : i32, i32
  }
  func.func @transform_5(%arg0: i32) -> (i32, i32) {
    %c0_i32 = arith.constant 0 : i32
    %c0_i32_0 = arith.constant 0 : i32
    return %c0_i32, %arg0 : i32, i32
  }
}

</mosaic_0001>

<bundles_post_ra>
// kernel: tpu_custom_call.1
= control target key start
LH: loop header
LB: loop body
LE: loop exit
PB: predicated region body
PF: predicated region fallthrough
CT: control target
= control target key end

     0   :  { %vm41_vm0 = vcmask 64512   ;;  %v469_v4 = vmov 0   ;;  %s568_s0 = inlined_call_operand.vmem [shape: f32[8,8], index: 0, kind: input, shape index: {}]   ;;  %s569_s1 = inlined_call_operand.vmem [shape: f32[16,8], index: 1, kind: input, shape index: {}]   ;;  %s570_s2 = inlined_call_operand.vmem [shape: f32[32,16], index: 2, kind: input, shape index: {}]   ;;  %s571_s3 = inlined_call_operand.vmem [shape: f32[8,32], index: 3, kind: input, shape index: {}]   ;;  %s572_s4 = inlined_call_operand.vmem [shape: f32[56,1], index: 4, kind: input, shape index: {}]   ;;  %s573_s5 = inlined_call_operand.hbm [shape: f32[8,8], index: 5, kind: output, shape index: {}]  }
   0x1   :  { %v21_v0 = vld [vmem:[%s568_s0] sm:$0xff]  ;;  %v30_v2 = vld [vmem:[%s569_s1 + $0x8] sm:$0xff]  ;;  %427 = vset.pattern.permute.xlu0 %v469_v4 }
   0x2   :  { %v29_v1 = vld [vmem:[%s569_s1] sm:$0xff]  ;;  %386 = vmatprep.subr.mxu0 %v21_v0 }
   0x3   :  { %388 = vmatprep.mubr.msk.f32.mxu0 %vm41_vm0, %v29_v1  ;;  %v22_v3 = vld [vmem:[%s572_s4] sm:$0xff]  ;;  %387 = vmatpush3.msra.mxu0 %v21_v0 }
   0x4   :  { %10 = vsyncpa [#allocation3], 0  ;;  %389 = vmatmul.mubr.msk.f32.vlgmr.msra.gmra.mrb[0].mxu0 %vm41_vm0, %v30_v2  ;;  %33 = vperm.xlu0 %427, %v22_v3   ;;  %v23_v5 = vld [vmem:[%s572_s4 + $0x8] sm:$0xff]  ;;  %v26_v6 = vld [vmem:[%s572_s4 + $0x20] sm:$0xff]  ;;  %vm149_vm1 = vcmask 130048   ;;  %v470_v24 = vmov 0.0|0.0   ;;  %v346_v55 = vlaneseq }
   0x5   :  { %428 = vset.pattern.permute.xlu1 %v469_v4  ;;  %v28_v7 = vld [vmem:[%s572_s4 + $0x30] sm:$0xff]  ;;  %v125_v8 = vld [vmem:[%s570_s2] sm:$0xff]  ;;  %v25_v10 = vld [vmem:[%s572_s4 + $0x18] sm:$0xff]  ;;  %416 = vmatprep.subr.bf16.mxu0 %v470_v24  ;;  %vm471_vm2 = vmmov 0   ;;  %v472_v25 = vmov 0.0   ;;  %vm257_vm3 = vcmask 261120  }
   0x6   :  { %395 = vmatprep.mubr.msk.f32.mxu1 %vm149_vm1, %v125_v8  ;;  %v24_v9 = vld [vmem:[%s572_s4 + $0x10] sm:$0xff]  ;;  %v27_v11 = vld [vmem:[%s572_s4 + $0x28] sm:$0xff]  ;;  %v128_v23 = vld [vmem:[%s570_s2 + $0x18] sm:$0xff]  ;;  %409 = vmatprep.mubr.msk.f32.mxu0 %vm471_vm2, %v472_v25  ;;  %v347_v58 = vshrl.u32 %v346_v55, 7 }
   0x7   :  { %131 = vperm.xlu1 %428, %v24_v9   ;;  %v126_v21 = vld [vmem:[%s570_s2 + $0x8] sm:$0xff]  ;;  %v127_v22 = vld [vmem:[%s570_s2 + $0x10] sm:$0xff]  ;;  %v251_v44 = vld [vmem:[%s571_s3] sm:$0xff]  ;;  %s473_s3 = smov [#allocation2]  }
   0x8   :  { %38 = vperm.xlu0 %427, %v23_v5   ;;  %s357_s19 = sshll.u32 %s473_s3, 4  ;;  %vm348_vm5 = vcmp.lt.s32.totalorder %v347_v58, 4  ;;  %s358_s19 = int_to_ptr.vmem [resolvable:$true] %s357_s19 }
   0x9   :  { %s445_s20 = scalar_lea.vmem %s358_s19, 128  ;;  %p450_p1 = scmp.lt.s32.totalorder %s358_s19, %s358_s19 }
   0xa   :  { %p446_p0 = scmp.ne.s32.totalorder %s358_s19, %s445_s20  ;;  %p451_p2 = scmp.lt.s32.totalorder %s445_s20, %s445_s20 }
   0xb   :  { %136 = vperm.xlu1 %428, %v25_v10  }
   0xc   :  { %141 = vperm.xlu0 %427, %v26_v6   ;;  %p452_p3 = por %p451_p2, %p450_p1 }
   0xe   :  { %p453_p4 = pnand %p452_p3, %p446_p0 }
   0xf   :  { %146 = vperm.xlu1 %428, %v27_v11  }
  0x10   :  { %254 = vperm.xlu0 %427, %v28_v7  }
  0x83   :  { %v34_v12 = vpop.permute.xlu0 %33 }
  0x86   :  { %v132_v26 = vpop.permute.xlu1 %131 }
  0x87   :  { %v39_v13 = vpop.permute.xlu0 %38 }
  0x8a   :  { %v137_v27 = vpop.permute.xlu1 %136 }
  0x8b   :  { %v142_v34 = vpop.permute.xlu0 %141 }
  0x8e   :  { %v147_v32 = vpop.permute.xlu1 %146 }
  0x8f   :  { %v255_v45 = vpop.permute.xlu0 %254 }
  0xd7   :  { %v390_v14 = vpop.f32.mrb[0].mxu0 }
  0xd8   :  { %v120_v15 = vadd.f32 %v390_v14, %v39_v13  ;;  %v114_v16 = vpop.f32.mrb[1].mxu0 }
  0xd9   :  { %v115_v17 = vadd.f32 %v114_v16, %v34_v12 }
  0xda   :  { %429 = vtanh.f32 %v120_v15 }
  0xdb   :  { %431 = vtanh.f32 %v115_v17 }
  0xe4   :  { %v430_v18 = vpop.eup %429 }
  0xe5   :  { %v432_v19 = vpop.eup %431 }
  0xe6   :  { %v412_v20 = vpack.c.bf16 %v430_v18, %v432_v19 }
  0xe8   :  { %413 = vmatprep.subr.bf16.mxu1 %v412_v20 }
  0xe9   :  { %415 = vmatpush3.bf16.msra.mxu1 %v412_v20 }
  0xec   :  { %396 = vmatmul.mubr.msk.f32.vlgmr.msra.gmra.mrb[0].mxu1 %vm149_vm1, %v126_v21 }
  0xed   :  { %398 = vmatprep.mubr.msk.f32.mxu1 %vm149_vm1, %v127_v22 }
  0xf0   :  { %399 = vmatmul.mubr.msk.f32.gmra.mrb[2].mxu1 %vm149_vm1, %v128_v23 }
 0x1bf   :  { %v397_v28 = vpop.f32.mrb[0].mxu1 }
 0x1c0   :  { %v234_v29 = vadd.f32 %v397_v28, %v137_v27  ;;  %v228_v30 = vpop.f32.mrb[1].mxu1 }
 0x1c1   :  { %v229_v31 = vadd.f32 %v228_v30, %v132_v26 }
 0x1c2   :  { %433 = vtanh.f32 %v234_v29 }
 0x1c3   :  { %435 = vtanh.f32 %v229_v31  ;;  %v400_v33 = vpop.f32.mrb[2].mxu1 }
 0x1c4   :  { %v244_v35 = vadd.f32 %v400_v33, %v147_v32  ;;  %v238_v36 = vpop.f32.mrb[3].mxu1 }
 0x1c5   :  { %v239_v37 = vadd.f32 %v238_v36, %v142_v34 }
 0x1c6   :  { %437 = vtanh.f32 %v244_v35 }
 0x1c7   :  { %439 = vtanh.f32 %v239_v37 }
 0x1cc   :  { %v434_v38 = vpop.eup %433 }
 0x1cd   :  { %v436_v39 = vpop.eup %435 }
 0x1ce   :  { %v417_v40 = vpack.c.bf16 %v434_v38, %v436_v39 }
 0x1d0   :  { %v438_v41 = vpop.eup %437  ;;  %418 = vmatpush3.bf16.msra.mxu0 %v417_v40 }
 0x1d1   :  { %v440_v42 = vpop.eup %439  ;;  %419 = vmatprep.subr.bf16.mxu0 %v470_v24 }
 0x1d2   :  { %v420_v43 = vpack.c.bf16 %v438_v41, %v440_v42 }
 0x1d4   :  { %421 = vmatpush3.bf16.msra.mxu0 %v420_v43 }
 0x1d7   :  { %410 = vmatmul.mubr.msk.f32.vlgmr.msra.gmra.mrb[2].mxu0 %vm257_vm3, %v251_v44 }
 0x2aa   :  { %v327_v46 = vpop.f32.mrb[2].mxu0 }
 0x2ab   :  { %v328_v47 = vadd.f32 %v327_v46, %v255_v45  ;;  %v411_v48 = vpop.f32.mrb[3].mxu0 }
 0x2ad   :  { %v332_v49 = vand.u32 2147483647, %v328_v47  ;;  %v331_v62 = vmax.f32 %v328_v47, 0.0 }
 0x2af   :  { %v333_v50 = vsub.f32 0.0, %v332_v49 }
 0x2b1   :  { %v334_v51 = vmul.f32 1.442695, %v333_v50 }
 0x2b3   :  { %441 = vpow2.f32 %v334_v51 }
 0x2bd   :  { %v442_v52 = vpop.eup %441 }
 0x2be   :  { %v336_v53 = vadd.f32 1.0, %v442_v52  ;;  %v339_v54 = vmul.f32 -0.5, %v442_v52  ;;  %v342_v57 = vand.u32 2147483647, %v442_v52 }
 0x2c0   :  { %443 = vlog2.f32 %v336_v53  ;;  %v340_v56 = vadd.f32 1.0, %v339_v54  ;;  %vm343_vm4 = vcmp.lt.f32.partialorder %v342_v57, 0.0004427343 }
 0x2c2   :  { %v341_v61 = vmul.f32 %v442_v52, %v340_v56 }
 0x2ca   :  { %v444_v59 = vpop.eup %443 }
 0x2cb   :  { %v338_v60 = vmul.f32 0.6931472, %v444_v59 }
 0x2cd   :  { %v344_v63 = vsel %vm343_vm4, %v341_v61, %v338_v60 }
 0x2ce   :  { %v345_v0 = vadd.f32 %v344_v63, %v331_v62 }
 0x2d0   :  { %v349_v1 = vsel %vm348_vm5, %v328_v47, %v345_v0 }
 0x2d1   :  { %350 = vst.msk [vmem:[#allocation2] sm:$0xff] %vm41_vm0, %v349_v1 }
 0x2d2   :  { %456 = shalt.err (!%p453_p4)
}
 0x2d3   :  { %s457_s23 = scalar_lea.hbm %s573_s5, 128 }
 0x2d4   :  { %p458_p5 = scmp.ne.s32.totalorder %s573_s5, %s457_s23  ;;  %p461_p6 = scmp.lt.u32.totalorder %s457_s23, %s573_s5 }
 0x2d6   :  { %p463_p7 = pnand %p461_p6, %p458_p5 }
 0x2d8   :  { %466 = shalt.err (!%p463_p7)
}
 0x2d9   :  { %360 = dma.vmem_to_hbm [thread:$0]  %s358_s19, 128, %s573_s5, [#allocation3]  }
 0x2da   :  { %467 = dma.done.wait [#allocation3], 128  }
 0x2db   :  { %468 = vsyncadd [#allocation3], 4294967168 }
 0x2dc   :  { %364 = vsyncpa [#allocation3], 1 }

</bundles_post_ra>
